<compile_context>
chip_gen: v5e
topology: v5e:2x2
jax: 0.10.0
libtpu: 0.0.40
codegen_flags: <defaults>
</compile_context>

<pallas_src>
import functools

import jax
import jax.numpy as jnp
from jax.experimental import pallas as pl
from jax.experimental.pallas import tpu as pltpu

HIDDEN = 512
SUBLANE = 16   # bf16 sublane granule
LANE = 128


def _round_up(x, m):
    return ((x + m - 1) // m) * m


def _num_tensorcores():
    """v7x has 2 TensorCores per chip; v5e/v6e have 1."""
    try:
        kind = jax.devices()[0].device_kind.lower()
    except Exception:
        return 1
    return 2 if "v7" in kind else 1


def _mlp_kernel(x_ref, w1_ref, b1_ref, w2_ref, b2_ref, w3_ref, b3_ref, o_ref):
    # Fused 3-layer MLP: bf16 matmuls on the MXU with f32 accumulation,
    # bias-add + ReLU on the f32 accumulator (VPU), all resident in VMEM.
    x = x_ref[...]
    h1 = jnp.dot(x, w1_ref[...], preferred_element_type=jnp.float32) + b1_ref[...]
    h1 = jnp.maximum(h1, 0.0).astype(w2_ref.dtype)
    h2 = jnp.dot(h1, w2_ref[...], preferred_element_type=jnp.float32) + b2_ref[...]
    h2 = jnp.maximum(h2, 0.0).astype(w3_ref.dtype)
    out = jnp.dot(h2, w3_ref[...], preferred_element_type=jnp.float32) + b3_ref[...]
    o_ref[...] = out.astype(o_ref.dtype)


def prepare_params(params):
    """One-time device-side weight prep, hoisted out of the per-call forward.

    f32 master weights -> bf16 MXU copies; output layer lane-padded to 128.
    Re-run only after optimizer updates of the f32 masters.
    """
    # TODO(synk): on v7x, optionally store w2 in fp8 with a per-tensor scale
    # (accuracy must be validated; fp8 is not a drop-in for bf16).
    a_dim = params["w3"].shape[1]
    a_pad = _round_up(a_dim, LANE)
    w3 = params["w3"].astype(jnp.bfloat16)
    b3 = params["b3"].astype(jnp.float32)
    if a_pad != a_dim:
        w3 = jnp.pad(w3, ((0, 0), (0, a_pad - a_dim)))
        b3 = jnp.pad(b3, ((0, 0), (0, a_pad - a_dim)))
    return {
        "w1": params["w1"].astype(jnp.bfloat16),
        "b1": params["b1"].astype(jnp.float32),
        "w2": params["w2"].astype(jnp.bfloat16),
        "b2": params["b2"].astype(jnp.float32),
        "w3": w3,
        "b3": b3,
    }


@functools.partial(jax.jit,
                   static_argnames=("a_dim", "block_b", "num_cores", "out_dtype"))
def net_forward(x, prep, *, a_dim, block_b=512, num_cores=1,
                out_dtype=jnp.float32):
    """DQN forward pass as a single fused, batch-gridded Pallas kernel.

    x: (B, s_dim) float32
    prep: output of prepare_params() (bf16 weights, lane-padded output layer)
    returns: (B, a_dim) in out_dtype (actions_value)
    """
    B, s_dim = x.shape
    a_pad = prep["w3"].shape[1]

    # Balanced batch tiling: minimize padding waste, round tile rows to the
    # bf16 sublane granule.  On multi-core chips (v7x) force >= num_cores grid
    # steps (once B is large enough) so the parallel axis spans both cores.
    nt = pl.cdiv(B, block_b)
    if num_cores > 1 and B >= 2 * SUBLANE:
        nt = max(nt, num_cores)
    tb = _round_up(pl.cdiv(B, nt), SUBLANE)
    b_pad = nt * tb

    x_p = x.astype(jnp.bfloat16)
    if b_pad != B:
        x_p = jnp.pad(x_p, ((0, b_pad - B), (0, 0)))

    def batch_spec(n):
        return pl.BlockSpec((tb, n), lambda i: (i, 0))

    def const_spec(shape):
        # Same block index every grid step -> weights/biases stay VMEM-resident;
        # single buffer (no pipelining needed for a never-changing block).
        return pl.BlockSpec(shape, lambda i: (0, 0), pipeline_mode=pl.Buffered(1))

    out = pl.pallas_call(
        _mlp_kernel,
        out_shape=jax.ShapeDtypeStruct((b_pad, a_pad), out_dtype),
        grid=(nt,),
        in_specs=[
            batch_spec(s_dim),
            const_spec((s_dim, HIDDEN)),
            const_spec((1, HIDDEN)),
            const_spec((HIDDEN, HIDDEN)),
            const_spec((1, HIDDEN)),
            const_spec((HIDDEN, a_pad)),
            const_spec((1, a_pad)),
        ],
        out_specs=batch_spec(a_pad),
        compiler_params=pltpu.CompilerParams(
            dimension_semantics=("parallel",),
            vmem_limit_bytes=16 << 20,
        ),
    )(x_p, prep["w1"], prep["b1"], prep["w2"], prep["b2"], prep["w3"], prep["b3"])

    return out[:B, :a_dim]


def init_params(key, s_dim, a_dim):
    """Parameter init mirroring Net.initialize():
    kaiming_normal_ on Linear weights (std = sqrt(2 / fan_in)),
    PyTorch default uniform(-1/sqrt(fan_in), 1/sqrt(fan_in)) for biases."""
    k = jax.random.split(key, 6)

    def kaiming(k_, fan_in, fan_out):
        # Stored as (in, out) == transpose of PyTorch's (out, in) weight.
        return (jnp.sqrt(2.0 / fan_in)
                * jax.random.normal(k_, (fan_in, fan_out), dtype=jnp.float32))

    def bias(k_, fan_in, fan_out):
        bound = 1.0 / jnp.sqrt(fan_in)
        return jax.random.uniform(k_, (1, fan_out), dtype=jnp.float32,
                                  minval=-bound, maxval=bound)

    return {
        "w1": kaiming(k[0], s_dim, HIDDEN), "b1": bias(k[1], s_dim, HIDDEN),
        "w2": kaiming(k[2], HIDDEN, HIDDEN), "b2": bias(k[3], HIDDEN, HIDDEN),
        "w3": kaiming(k[4], HIDDEN, a_dim), "b3": bias(k[5], HIDDEN, a_dim),
    }


def _reference(x, params):
    h1 = jnp.maximum(x @ params["w1"] + params["b1"], 0.0)
    h2 = jnp.maximum(h1 @ params["w2"] + params["b2"], 0.0)
    return h2 @ params["w3"] + params["b3"]


if __name__ == "__main__":
    S_DIM, A_DIM = 32, 16
    key = jax.random.PRNGKey(0)
    kx, kp, kx2 = jax.random.split(key, 3)
    params = init_params(kp, S_DIM, A_DIM)

    # One-time weight prep (bf16 cast + lane padding) -- hoisted off the
    # per-call forward path.
    prep = jax.tree_util.tree_map(lambda a: a, prepare_params(params))
    jax.block_until_ready(prep)
    n_cores = _num_tensorcores()

    # Small RL-style act() batch: 8 states.
    x_small = jax.random.normal(kx, (8, S_DIM), dtype=jnp.float32)
    y_small = net_forward(x_small, prep, a_dim=A_DIM, num_cores=n_cores)
    jax.block_until_ready(y_small)
    ref_small = _reference(x_small, params)
    assert y_small.shape == (8, A_DIM)
    # bf16 weights/activations (f32 accumulation) -> loosened tolerance.
    assert jnp.allclose(y_small, ref_small, atol=5e-2, rtol=5e-2)

    # Larger, non-tile-multiple batch exercising the balanced batch grid.
    x_big = jax.random.normal(kx2, (300, S_DIM), dtype=jnp.float32)
    y_big = net_forward(x_big, prep, a_dim=A_DIM, num_cores=n_cores)
    jax.block_until_ready(y_big)
    ref_big = _reference(x_big, params)
    assert y_big.shape == (300, A_DIM)
    assert jnp.allclose(y_big, ref_big, atol=5e-2, rtol=5e-2)

    print("KERNEL_OK")
</pallas_src>

<mosaic_0001>
module attributes {stable_mosaic.version = 11 : i64} {
  func.func @_mlp_kernel(%arg0: i32, %arg1: memref<16x32xbf16, #tpu.memory_space<vmem>>, %arg2: memref<32x512xbf16, #tpu.memory_space<vmem>>, %arg3: memref<1x512xf32, #tpu.memory_space<vmem>>, %arg4: memref<512x512xbf16, #tpu.memory_space<vmem>>, %arg5: memref<1x512xf32, #tpu.memory_space<vmem>>, %arg6: memref<512x128xbf16, #tpu.memory_space<vmem>>, %arg7: memref<1x128xf32, #tpu.memory_space<vmem>>, %arg8: memref<16x128xf32, #tpu.memory_space<vmem>>) attributes {dimension_semantics = [#tpu.dimension_semantics<parallel>], iteration_bounds = array<i64: 1>, scalar_prefetch = 0 : i64, scratch_operands = 0 : i64, tpu.core_type = #tpu.core_type<tc>, window_params = [{transform_indices = @transform_0, window_bounds = array<i64: 16, 32>}, {pipeline_mode = #tpu.pipeline_mode<synchronous>, transform_indices = @transform_1, window_bounds = array<i64: 32, 512>}, {pipeline_mode = #tpu.pipeline_mode<synchronous>, transform_indices = @transform_2, window_bounds = array<i64: 1, 512>}, {pipeline_mode = #tpu.pipeline_mode<synchronous>, transform_indices = @transform_3, window_bounds = array<i64: 512, 512>}, {pipeline_mode = #tpu.pipeline_mode<synchronous>, transform_indices = @transform_4, window_bounds = array<i64: 1, 512>}, {pipeline_mode = #tpu.pipeline_mode<synchronous>, transform_indices = @transform_5, window_bounds = array<i64: 512, 128>}, {pipeline_mode = #tpu.pipeline_mode<synchronous>, transform_indices = @transform_6, window_bounds = array<i64: 1, 128>}, {transform_indices = @transform_7, window_bounds = array<i64: 16, 128>}]} {
    %c0 = arith.constant 0 : index
    %c0_0 = arith.constant 0 : index
    %0 = vector.load %arg1[%c0, %c0_0] : memref<16x32xbf16, #tpu.memory_space<vmem>>, vector<16x32xbf16>
    %c0_1 = arith.constant 0 : index
    %c0_2 = arith.constant 0 : index
    %1 = vector.load %arg2[%c0_1, %c0_2] : memref<32x512xbf16, #tpu.memory_space<vmem>>, vector<32x512xbf16>
    %cst = arith.constant dense<0.000000e+00> : vector<16x512xf32>
    %2 = tpu.matmul %0, %1, %cst {dimension_numbers = #tpu.dot_dimension_numbers<[1], [0], [0], [1], [0, 0, 1, 1], [], []>} : vector<16x32xbf16>, vector<32x512xbf16>, vector<16x512xf32> -> vector<16x512xf32>
    %c0_3 = arith.constant 0 : index
    %c0_4 = arith.constant 0 : index
    %3 = vector.load %arg3[%c0_3, %c0_4] : memref<1x512xf32, #tpu.memory_space<vmem>>, vector<1x512xf32>
    %4 = vector.broadcast %3 : vector<1x512xf32> to vector<16x512xf32>
    %5 = arith.addf %2, %4 : vector<16x512xf32>
    %cst_5 = arith.constant 0.000000e+00 : f32
    %6 = vector.broadcast %cst_5 : f32 to vector<16x512xf32>
    %7 = arith.maximumf %5, %6 : vector<16x512xf32>
    %8 = arith.truncf %7 : vector<16x512xf32> to vector<16x512xbf16>
    %c0_6 = arith.constant 0 : index
    %c0_7 = arith.constant 0 : index
    %9 = vector.load %arg4[%c0_6, %c0_7] : memref<512x512xbf16, #tpu.memory_space<vmem>>, vector<512x512xbf16>
    %cst_8 = arith.constant dense<0.000000e+00> : vector<16x512xf32>
    %10 = tpu.matmul %8, %9, %cst_8 {dimension_numbers = #tpu.dot_dimension_numbers<[1], [0], [0], [1], [0, 0, 1, 1], [], []>} : vector<16x512xbf16>, vector<512x512xbf16>, vector<16x512xf32> -> vector<16x512xf32>
    %c0_9 = arith.constant 0 : index
    %c0_10 = arith.constant 0 : index
    %11 = vector.load %arg5[%c0_9, %c0_10] : memref<1x512xf32, #tpu.memory_space<vmem>>, vector<1x512xf32>
    %12 = vector.broadcast %11 : vector<1x512xf32> to vector<16x512xf32>
    %13 = arith.addf %10, %12 : vector<16x512xf32>
    %cst_11 = arith.constant 0.000000e+00 : f32
    %14 = vector.broadcast %cst_11 : f32 to vector<16x512xf32>
    %15 = arith.maximumf %13, %14 : vector<16x512xf32>
    %16 = arith.truncf %15 : vector<16x512xf32> to vector<16x512xbf16>
    %c0_12 = arith.constant 0 : index
    %c0_13 = arith.constant 0 : index
    %17 = vector.load %arg6[%c0_12, %c0_13] : memref<512x128xbf16, #tpu.memory_space<vmem>>, vector<512x128xbf16>
    %cst_14 = arith.constant dense<0.000000e+00> : vector<16x128xf32>
    %18 = tpu.matmul %16, %17, %cst_14 {dimension_numbers = #tpu.dot_dimension_numbers<[1], [0], [0], [1], [0, 0, 1, 1], [], []>} : vector<16x512xbf16>, vector<512x128xbf16>, vector<16x128xf32> -> vector<16x128xf32>
    %c0_15 = arith.constant 0 : index
    %c0_16 = arith.constant 0 : index
    %19 = vector.load %arg7[%c0_15, %c0_16] : memref<1x128xf32, #tpu.memory_space<vmem>>, vector<1x128xf32>
    %20 = vector.broadcast %19 : vector<1x128xf32> to vector<16x128xf32>
    %21 = arith.addf %18, %20 : vector<16x128xf32>
    %c0_17 = arith.constant 0 : index
    %c0_18 = arith.constant 0 : index
    %22 = vector.load %arg8[%c0_17, %c0_18] : memref<16x128xf32, #tpu.memory_space<vmem>>, vector<16x128xf32>
    tpu.vector_store %arg8[%c0_17, %c0_18], %21 {strides = array<i32>} : memref<16x128xf32, #tpu.memory_space<vmem>>, vector<16x128xf32>,
    return
  }
  func.func @transform_0(%arg0: i32) -> (i32, i32) {
    %c0_i32 = arith.constant 0 : i32
    %c0_i32_0 = arith.constant 0 : i32
    return %arg0, %c0_i32 : i32, i32
  }
  func.func @transform_1(%arg0: i32) -> (i32, i32) {
    %c0_i32 = arith.constant 0 : i32
    %c0_i32_0 = arith.constant 0 : i32
    %c0_i32_1 = arith.constant 0 : i32
    return %c0_i32, %c0_i32_0 : i32, i32
  }
  func.func @transform_2(%arg0: i32) -> (i32, i32) {
    %c0_i32 = arith.constant 0 : i32
    %c0_i32_0 = arith.constant 0 : i32
    %c0_i32_1 = arith.constant 0 : i32
    return %c0_i32, %c0_i32_0 : i32, i32
  }
  func.func @transform_3(%arg0: i32) -> (i32, i32) {
    %c0_i32 = arith.constant 0 : i32
    %c0_i32_0 = arith.constant 0 : i32
    %c0_i32_1 = arith.constant 0 : i32
    return %c0_i32, %c0_i32_0 : i32, i32
  }
  func.func @transform_4(%arg0: i32) -> (i32, i32) {
    %c0_i32 = arith.constant 0 : i32
    %c0_i32_0 = arith.constant 0 : i32
    %c0_i32_1 = arith.constant 0 : i32
    return %c0_i32, %c0_i32_0 : i32, i32
  }
  func.func @transform_5(%arg0: i32) -> (i32, i32) {
    %c0_i32 = arith.constant 0 : i32
    %c0_i32_0 = arith.constant 0 : i32
    %c0_i32_1 = arith.constant 0 : i32
    return %c0_i32, %c0_i32_0 : i32, i32
  }
  func.func @transform_6(%arg0: i32) -> (i32, i32) {
    %c0_i32 = arith.constant 0 : i32
    %c0_i32_0 = arith.constant 0 : i32
    %c0_i32_1 = arith.constant 0 : i32
    return %c0_i32, %c0_i32_0 : i32, i32
  }
  func.func @transform_7(%arg0: i32) -> (i32, i32) {
    %c0_i32 = arith.constant 0 : i32
    %c0_i32_0 = arith.constant 0 : i32
    return %arg0, %c0_i32 : i32, i32
  }
}

</mosaic_0001>

<bundles_post_ra>
// kernel: net_forward.1
= control target key start
LH: loop header
LB: loop body
LE: loop exit
PB: predicated region body
PF: predicated region fallthrough
CT: control target
= control target key end

     0   :  { %12 = vsyncpa [#allocation3], 0  ;;  %s2590_s0 = inlined_call_operand.vmem [shape: bf16[16,32], index: 0, kind: input, shape index: {}]   ;;  %s2591_s1 = inlined_call_operand.hbm [shape: bf16[32,512], index: 1, kind: input, shape index: {}]   ;;  %s2592_s2 = inlined_call_operand.vmem [shape: f32[1,512], index: 2, kind: input, shape index: {}]   ;;  %s2593_s3 = inlined_call_operand.hbm [shape: bf16[512,512], index: 3, kind: input, shape index: {}]   ;;  %s2594_s4 = inlined_call_operand.vmem [shape: f32[1,512], index: 4, kind: input, shape index: {}]   ;;  %s2595_s5 = inlined_call_operand.hbm [shape: bf16[512,128], index: 5, kind: input, shape index: {}]   ;;  %s2596_s6 = inlined_call_operand.vmem [shape: f32[1,128], index: 6, kind: input, shape index: {}]   ;;  %s2597_s7 = inlined_call_operand.vmem [shape: f32[16,128], index: 7, kind: output, shape index: {}]  }
   0x1   :  { %13 = vsyncpa [#allocation5], 0  ;;  %s35_s26 = sshll.u32 %s2593_s3, 4  ;;  %s2482_s27 = smov [#allocation4]   ;;  %s36_s26 = int_to_ptr.hbm [resolvable:$true] %s35_s26 }
   0x2   :  { %s37_s28 = sshll.u32 %s2482_s27, 4  ;;  %s20_s8 = sshll.u32 %s2591_s1, 4  ;;  %s38_s28 = int_to_ptr.vmem [resolvable:$true] %s37_s28  ;;  %s21_s8 = int_to_ptr.hbm [resolvable:$true] %s20_s8 }
   0x3   :  { %s2483_s9 = smov 256   ;;  %s2484_s10 = smov 16  }
   0x4   :  { %43 = dma.hbm_to_vmem [thread:$0]  %s36_s26, 16384, %s38_s28, [#allocation5], %s2483_s9, %s2483_s9, %s2484_s10  }
   0x5   :  { %s2485_s11 = smov [#allocation2]   ;;  %s50_s15 = sshll.u32 %s2595_s5, 4  ;;  %s51_s15 = int_to_ptr.hbm [resolvable:$true] %s50_s15 }
   0x6   :  { %s22_s12 = sshll.u32 %s2485_s11, 4  ;;  %s2486_s3 = smov [#allocation6]   ;;  %s23_s12 = int_to_ptr.vmem [resolvable:$true] %s22_s12 }
   0x7   :  { %28 = dma.hbm_to_vmem [thread:$0]  %s21_s8, 1024, %s23_s12, [#allocation3], %s2483_s9, %s2483_s9, %s2484_s10  }
   0x8   :  { %s52_s16 = sshll.u32 %s2486_s3, 4  ;;  %s2487_s17 = smov 64   ;;  %s53_s16 = int_to_ptr.vmem [resolvable:$true] %s52_s16 }
   0x9   :  { %s2488_s18 = smov 4  }
   0xa   :  { %58 = dma.hbm_to_vmem [thread:$0]  %s51_s15, 4096, %s53_s16, [#allocation5], %s2487_s17, %s2487_s17, %s2488_s18  }
   0xb   :  { %2478 = dma.done.wait [#allocation3], 1024  }
   0xc   :  { %2479 = vsyncadd [#allocation3], 4294966272 }
   0xd   :  { %2480 = dma.done.wait [#allocation5], 20480  }
   0xe   :  { %2481 = vsyncadd [#allocation5], 4294946816  ;;  %v1571_v0 = vld [vmem:[#allocation2 + $0x20] sm:$0xf]  ;;  %v2236_v1 = vld [vmem:[#allocation2 + $0x2c] sm:$0xf0] }
   0xf   :  { %v2234_v2 = vld [vmem:[#allocation2 + $0x24] sm:$0xf]  ;;  %v1572_v3 = vor.u32 %v2236_v1, %v1571_v0  ;;  %v1573_v4 = vld [vmem:[#allocation2 + $0x30] sm:$0xf0]  ;;  %v1579_v5 = vld [vmem:[#allocation2 + $0x28] sm:$0xf] }
  0x10   :  { %v2237_v6 = vld [vmem:[#allocation2 + $0x34] sm:$0xf0]  ;;  %v1576_v7 = vor.u32 %v2234_v2, %v1573_v4  ;;  %v2235_v9 = vld [vmem:[#allocation2 + $0x2c] sm:$0xf]  ;;  %v1581_v10 = vld [vmem:[#allocation2 + $0x38] sm:$0xf0] }
  0x11   :  { %v1580_v8 = vor.u32 %v2237_v6, %v1579_v5  ;;  %v1555_v11 = vld [vmem:[#allocation2] sm:$0xf]  ;;  %149 = vmatpush.bf16.msra.mxu0 %v1572_v3  ;;  %v1584_v12 = vor.u32 %v2235_v9, %v1581_v10  ;;  %v2232_v13 = vld [vmem:[#allocation2 + $0xc] sm:$0xf0]  ;;  %v2230_v14 = vld [vmem:[#allocation2 + $0x4] sm:$0xf] }
  0x12   :  { %v1557_v15 = vld [vmem:[#allocation2 + $0x10] sm:$0xf0]  ;;  %163 = vmatpush.bf16.msra.mxu1 %v1576_v7  ;;  %v1556_v16 = vor.u32 %v2232_v13, %v1555_v11  ;;  %v1563_v18 = vld [vmem:[#allocation2 + $0x8] sm:$0xf]  ;;  %v2233_v19 = vld [vmem:[#allocation2 + $0x14] sm:$0xf0] }
  0x13   :  { %177 = vmatpush.bf16.msra.mxu2 %v1580_v8  ;;  %v1560_v17 = vor.u32 %v2230_v14, %v1557_v15  ;;  %v2231_v20 = vld [vmem:[#allocation2 + $0xc] sm:$0xf]  ;;  %191 = vmatpush.bf16.msra.mxu3 %v1584_v12  ;;  %v1564_v21 = vor.u32 %v2233_v19, %v1563_v18  ;;  %v1565_v22 = vld [vmem:[#allocation2 + $0x18] sm:$0xf0]  ;;  %v2229_v23 = vld [vmem:[%s2590_s0] sm:$0xff]  ;;  %vm139_vm0 = vcmask 261120  }
  0x14   :  { %v1703_v24 = vld [vmem:[#allocation4 + $0xe0] sm:$0xf]  ;;  %v1568_v25 = vor.u32 %v2231_v20, %v1565_v22  ;;  %v2268_v26 = vld [vmem:[#allocation4 + $0xec] sm:$0xf0] }
  0x15   :  { %v1831_v27 = vld [vmem:[#allocation4 + $0x1e0] sm:$0xf]  ;;  %v2300_v28 = vld [vmem:[#allocation4 + $0x1ec] sm:$0xf0]  ;;  %150 = vmatpush.bf16.msra.mxu0 %v1556_v16  ;;  %v1704_v29 = vor.u32 %v2268_v26, %v1703_v24 }
  0x16   :  { %v1832_v30 = vor.u32 %v2300_v28, %v1831_v27  ;;  %v1687_v31 = vld [vmem:[#allocation4 + $0xc0] sm:$0xf]  ;;  %v2264_v32 = vld [vmem:[#allocation4 + $0xcc] sm:$0xf0]  ;;  %164 = vmatpush.bf16.msra.mxu1 %v1560_v17 }
  0x17   :  { %v1815_v33 = vld [vmem:[#allocation4 + $0x1c0] sm:$0xf]  ;;  %178 = vmatpush.bf16.msra.mxu2 %v1564_v21  ;;  %v2296_v34 = vld [vmem:[#allocation4 + $0x1cc] sm:$0xf0]  ;;  %192 = vmatpush.bf16.msra.mxu3 %v1568_v25  ;;  %v1688_v37 = vor.u32 %v2264_v32, %v1687_v31 }
  0x18   :  { %v1959_v35 = vld [vmem:[#allocation4 + $0x2e0] sm:$0xf]  ;;  %v2332_v36 = vld [vmem:[#allocation4 + $0x2ec] sm:$0xf0]  ;;  %1585 = vmatmul.msk.bf16.vlgmr.msra.gmra.mxu0 %vm139_vm0, %v2229_v23  ;;  %v1816_v42 = vor.u32 %v2296_v34, %v1815_v33 }
  0x19   :  { %989 = vmatpush.bf16.msrb.mxu0 %v1704_v29  ;;  %v1960_v38 = vor.u32 %v2332_v36, %v1959_v35  ;;  %v2087_v39 = vld [vmem:[#allocation4 + $0x3e0] sm:$0xf]  ;;  %v2364_v40 = vld [vmem:[#allocation4 + $0x3ec] sm:$0xf0]  ;;  %1586 = vmatmul.msk.bf16.vlgmr.msra.gmra.mxu1 %vm139_vm0, %v2229_v23 }
  0x1a   :  { %v1671_v41 = vld [vmem:[#allocation4 + $0xa0] sm:$0xf]  ;;  %1003 = vmatpush.bf16.msrb.mxu1 %v1832_v30  ;;  %v2088_v43 = vor.u32 %v2364_v40, %v2087_v39  ;;  %v2260_v44 = vld [vmem:[#allocation4 + $0xac] sm:$0xf0]  ;;  %1587 = vmatmul.msk.bf16.vlgmr.msra.gmra.mxu2 %vm139_vm0, %v2229_v23 }
  0x1b   :  { %v1799_v45 = vld [vmem:[#allocation4 + $0x1a0] sm:$0xf]  ;;  %v2292_v46 = vld [vmem:[#allocation4 + $0x1ac] sm:$0xf0]  ;;  %1588 = vmatmul.msk.bf16.vlgmr.msra.gmra.mxu3 %vm139_vm0, %v2229_v23  ;;  %1017 = vmatpush.bf16.msrb.mxu2 %v1960_v38  ;;  %v1672_v52 = vor.u32 %v2260_v44, %v1671_v41 }
  0x1c   :  { %v1943_v47 = vld [vmem:[#allocation4 + $0x2c0] sm:$0xf]  ;;  %v2328_v48 = vld [vmem:[#allocation4 + $0x2cc] sm:$0xf0]  ;;  %1031 = vmatpush.bf16.msrb.mxu3 %v2088_v43  ;;  %v1800_v57 = vor.u32 %v2292_v46, %v1799_v45 }
  0x1d   :  { %v2071_v49 = vld [vmem:[#allocation4 + $0x3c0] sm:$0xf]  ;;  %v1944_v50 = vor.u32 %v2328_v48, %v1943_v47  ;;  %v2360_v51 = vld [vmem:[#allocation4 + $0x3cc] sm:$0xf0]  ;;  %990 = vmatpush.bf16.msrb.mxu0 %v1688_v37  ;;  %v2266_v47 = vld [vmem:[#allocation4 + $0xe4] sm:$0xf] }
  0x1e   :  { %v2072_v53 = vor.u32 %v2360_v51, %v2071_v49  ;;  %v1655_v54 = vld [vmem:[#allocation4 + $0x80] sm:$0xf]  ;;  %v2256_v55 = vld [vmem:[#allocation4 + $0x8c] sm:$0xf0]  ;;  %1004 = vmatpush.bf16.msrb.mxu1 %v1816_v42  ;;  %v1705_v48 = vld [vmem:[#allocation4 + $0xf0] sm:$0xf0] }
  0x1f   :  { %v1927_v56 = vld [vmem:[#allocation4 + $0x2a0] sm:$0xf]  ;;  %v2324_v58 = vld [vmem:[#allocation4 + $0x2ac] sm:$0xf0]  ;;  %1018 = vmatpush.bf16.msrb.mxu2 %v1944_v50  ;;  %v1656_v0 = vor.u32 %v2256_v55, %v1655_v54  ;;  %v2298_v49 = vld [vmem:[#allocation4 + $0x1e4] sm:$0xf] }
  0x20   :  { %v2055_v59 = vld [vmem:[#allocation4 + $0x3a0] sm:$0xf]  ;;  %v2356_v60 = vld [vmem:[#allocation4 + $0x3ac] sm:$0xf0]  ;;  %v1928_v63 = vor.u32 %v2324_v58, %v1927_v56  ;;  %1032 = vmatpush.bf16.msrb.mxu3 %v2072_v53  ;;  %v1833_v50 = vld [vmem:[#allocation4 + $0x1f0] sm:$0xf0] }
  0x21   :  { %v1783_v61 = vld [vmem:[#allocation4 + $0x180] sm:$0xf]  ;;  %v2288_v62 = vld [vmem:[#allocation4 + $0x18c] sm:$0xf0]  ;;  %991 = vmatpush.bf16.msrb.mxu0 %v1672_v52  ;;  %v2056_v1 = vor.u32 %v2356_v60, %v2055_v59  ;;  %v2262_v54 = vld [vmem:[#allocation4 + $0xc4] sm:$0xf]  ;;  %v1708_v60 = vor.u32 %v2266_v47, %v1705_v48 }
  0x22   :  { %v1639_v2 = vld [vmem:[#allocation4 + $0x60] sm:$0xf]  ;;  %v2320_v4 = vld [vmem:[#allocation4 + $0x28c] sm:$0xf0]  ;;  %1005 = vmatpush.bf16.msrb.mxu1 %v1800_v57  ;;  %v1784_v5 = vor.u32 %v2288_v62, %v1783_v61  ;;  %v1689_v55 = vld [vmem:[#allocation4 + $0xd0] sm:$0xf0] }
  0x23   :  { %v1911_v3 = vld [vmem:[#allocation4 + $0x280] sm:$0xf]  ;;  %v2252_v6 = vld [vmem:[#allocation4 + $0x6c] sm:$0xf0]  ;;  %1019 = vmatpush.bf16.msrb.mxu2 %v1928_v63  ;;  %v2330_v62 = vld [vmem:[#allocation4 + $0x2e4] sm:$0xf] }
  0x24   :  { %v2039_v7 = vld [vmem:[#allocation4 + $0x380] sm:$0xf]  ;;  %v2352_v8 = vld [vmem:[#allocation4 + $0x38c] sm:$0xf0]  ;;  %v1912_v11 = vor.u32 %v2320_v4, %v1911_v3  ;;  %1033 = vmatpush.bf16.msrb.mxu3 %v2056_v1  ;;  %v1640_v12 = vor.u32 %v2252_v6, %v1639_v2  ;;  %v1961_v63 = vld [vmem:[#allocation4 + $0x2f0] sm:$0xf0] }
  0x25   :  { %v1767_v9 = vld [vmem:[#allocation4 + $0x160] sm:$0xf]  ;;  %v2284_v10 = vld [vmem:[#allocation4 + $0x16c] sm:$0xf0]  ;;  %992 = vmatpush.bf16.msrb.mxu0 %v1656_v0  ;;  %v2040_v13 = vor.u32 %v2352_v8, %v2039_v7  ;;  %v1836_v0 = vor.u32 %v2298_v49, %v1833_v50  ;;  %v2362_v1 = vld [vmem:[#allocation4 + $0x3e4] sm:$0xf]  ;;  %v1964_v7 = vor.u32 %v2330_v62, %v1961_v63  ;;  %v1692_v8 = vor.u32 %v2262_v54, %v1689_v55 }
  0x26   :  { %v1623_v14 = vld [vmem:[#allocation4 + $0x40] sm:$0xf]  ;;  %v2316_v16 = vld [vmem:[#allocation4 + $0x26c] sm:$0xf0]  ;;  %1006 = vmatpush.bf16.msrb.mxu1 %v1784_v5  ;;  %v1768_v17 = vor.u32 %v2284_v10, %v1767_v9  ;;  %v2089_v2 = vld [vmem:[#allocation4 + $0x3f0] sm:$0xf0] }
  0x27   :  { %v1895_v15 = vld [vmem:[#allocation4 + $0x260] sm:$0xf]  ;;  %v2248_v18 = vld [vmem:[#allocation4 + $0x4c] sm:$0xf0]  ;;  %1020 = vmatpush.bf16.msrb.mxu2 %v1912_v11  ;;  %v2294_v3 = vld [vmem:[#allocation4 + $0x1c4] sm:$0xf]  ;;  %v2092_v9 = vor.u32 %v2362_v1, %v2089_v2 }
  0x28   :  { %v2023_v19 = vld [vmem:[#allocation4 + $0x360] sm:$0xf]  ;;  %v2348_v20 = vld [vmem:[#allocation4 + $0x36c] sm:$0xf0]  ;;  %v1896_v23 = vor.u32 %v2316_v16, %v1895_v15  ;;  %1034 = vmatpush.bf16.msrb.mxu3 %v2040_v13  ;;  %v1624_v24 = vor.u32 %v2248_v18, %v1623_v14  ;;  %v1817_v4 = vld [vmem:[#allocation4 + $0x1d0] sm:$0xf0] }
  0x29   :  { %v1751_v21 = vld [vmem:[#allocation4 + $0x140] sm:$0xf]  ;;  %v2280_v22 = vld [vmem:[#allocation4 + $0x14c] sm:$0xf0]  ;;  %993 = vmatpush.bf16.msrb.mxu0 %v1640_v12  ;;  %v2024_v25 = vor.u32 %v2348_v20, %v2023_v19  ;;  %v2258_v10 = vld [vmem:[#allocation4 + $0xa4] sm:$0xf]  ;;  %v1820_v13 = vor.u32 %v2294_v3, %v1817_v4 }
  0x2a   :  { %v1607_v26 = vld [vmem:[#allocation4 + $0x20] sm:$0xf]  ;;  %v2312_v28 = vld [vmem:[#allocation4 + $0x24c] sm:$0xf0]  ;;  %1007 = vmatpush.bf16.msrb.mxu1 %v1768_v17  ;;  %v1752_v29 = vor.u32 %v2280_v22, %v1751_v21  ;;  %v2326_v11 = vld [vmem:[#allocation4 + $0x2c4] sm:$0xf] }
  0x2b   :  { %v1879_v27 = vld [vmem:[#allocation4 + $0x240] sm:$0xf]  ;;  %v2244_v30 = vld [vmem:[#allocation4 + $0x2c] sm:$0xf0]  ;;  %1021 = vmatpush.bf16.msrb.mxu2 %v1896_v23  ;;  %v1945_v12 = vld [vmem:[#allocation4 + $0x2d0] sm:$0xf0] }
  0x2c   :  { %v2007_v31 = vld [vmem:[#allocation4 + $0x340] sm:$0xf]  ;;  %v2344_v32 = vld [vmem:[#allocation4 + $0x34c] sm:$0xf0]  ;;  %v1880_v35 = vor.u32 %v2312_v28, %v1879_v27  ;;  %1035 = vmatpush.bf16.msrb.mxu3 %v2024_v25  ;;  %v1608_v37 = vor.u32 %v2244_v30, %v1607_v26  ;;  %v1673_v14 = vld [vmem:[#allocation4 + $0xb0] sm:$0xf0]  ;;  %v1948_v19 = vor.u32 %v2326_v11, %v1945_v12 }
  0x2d   :  { %v1735_v33 = vld [vmem:[#allocation4 + $0x120] sm:$0xf]  ;;  %v2276_v34 = vld [vmem:[#allocation4 + $0x12c] sm:$0xf0]  ;;  %994 = vmatpush.bf16.msrb.mxu0 %v1624_v24  ;;  %v2008_v38 = vor.u32 %v2344_v32, %v2007_v31  ;;  %v2358_v15 = vld [vmem:[#allocation4 + $0x3c4] sm:$0xf]  ;;  %v1676_v20 = vor.u32 %v2258_v10, %v1673_v14 }
  0x2e   :  { %v1591_v36 = vld [vmem:[#allocation4] sm:$0xf]  ;;  %v2240_v39 = vld [vmem:[#allocation4 + $0xc] sm:$0xf0]  ;;  %1008 = vmatpush.bf16.msrb.mxu1 %v1752_v29  ;;  %v1736_v42 = vor.u32 %v2276_v34, %v1735_v33  ;;  %v2073_v16 = vld [vmem:[#allocation4 + $0x3d0] sm:$0xf0] }
  0x2f   :  { %v1863_v40 = vld [vmem:[#allocation4 + $0x220] sm:$0xf]  ;;  %v2308_v41 = vld [vmem:[#allocation4 + $0x22c] sm:$0xf0]  ;;  %1022 = vmatpush.bf16.msrb.mxu2 %v1880_v35  ;;  %v1592_v52 = vor.u32 %v2240_v39, %v1591_v36  ;;  %v2290_v17 = vld [vmem:[#allocation4 + $0x1a4] sm:$0xf]  ;;  %v2076_v21 = vor.u32 %v2358_v15, %v2073_v16 }
  0x30   :  { %v1719_v43 = vld [vmem:[#allocation4 + $0x100] sm:$0xf]  ;;  %v2340_v45 = vld [vmem:[#allocation4 + $0x32c] sm:$0xf0]  ;;  %v1864_v51 = vor.u32 %v2308_v41, %v1863_v40  ;;  %1036 = vmatpush.bf16.msrb.mxu3 %v2008_v38  ;;  %v1801_v18 = vld [vmem:[#allocation4 + $0x1b0] sm:$0xf0] }
  0x31   :  { %v1991_v44 = vld [vmem:[#allocation4 + $0x320] sm:$0xf]  ;;  %v2272_v46 = vld [vmem:[#allocation4 + $0x10c] sm:$0xf0]  ;;  %995 = vmatpush.bf16.msrb.mxu0 %v1608_v37  ;;  %v1804_v22 = vor.u32 %v2290_v17, %v1801_v18  ;;  %v2254_v23 = vld [vmem:[#allocation4 + $0x84] sm:$0xf] }
  0x32   :  { %v1992_v53 = vor.u32 %v2340_v45, %v1991_v44  ;;  %v1847_v56 = vld [vmem:[#allocation4 + $0x200] sm:$0xf]  ;;  %v2304_v57 = vld [vmem:[#allocation4 + $0x20c] sm:$0xf0]  ;;  %1009 = vmatpush.bf16.msrb.mxu1 %v1736_v42  ;;  %v1720_v59 = vor.u32 %v2272_v46, %v1719_v43  ;;  %v1657_v24 = vld [vmem:[#allocation4 + $0x90] sm:$0xf0] }
  0x33   :  { %v1975_v58 = vld [vmem:[#allocation4 + $0x300] sm:$0xf]  ;;  %v2336_v61 = vld [vmem:[#allocation4 + $0x30c] sm:$0xf0]  ;;  %1023 = vmatpush.bf16.msrb.mxu2 %v1864_v51  ;;  %v1848_v5 = vor.u32 %v2304_v57, %v1847_v56  ;;  %v2286_v25 = vld [vmem:[#allocation4 + $0x184] sm:$0xf]  ;;  %v1660_v27 = vor.u32 %v2254_v23, %v1657_v24 }
  0x34   :  { %1037 = vmatpush.bf16.msrb.mxu3 %v1992_v53  ;;  %v1976_v6 = vor.u32 %v2336_v61, %v1975_v58  ;;  %v1785_v26 = vld [vmem:[#allocation4 + $0x190] sm:$0xf0]  ;;  %v2322_v29 = vld [vmem:[#allocation4 + $0x2a4] sm:$0xf] }
  0x35   :  { %996 = vmatpush.bf16.msrb.mxu0 %v1592_v52  ;;  %v1788_v28 = vor.u32 %v2286_v25, %v1785_v26  ;;  %v1929_v30 = vld [vmem:[#allocation4 + $0x2b0] sm:$0xf0]  ;;  %v2354_v31 = vld [vmem:[#allocation4 + $0x3a4] sm:$0xf]  ;;  %v84_v25 = vld [vmem:[%s2592_s2] sm:$0xf] }
  0x36   :  { %1010 = vmatpush.bf16.msrb.mxu1 %v1720_v59  ;;  %v1932_v32 = vor.u32 %v2322_v29, %v1929_v30  ;;  %v2057_v33 = vld [vmem:[#allocation4 + $0x3b0] sm:$0xf0]  ;;  %v2250_v35 = vld [vmem:[#allocation4 + $0x64] sm:$0xf]  ;;  %v87_v29 = vperm.slane %v84_v25, 1 }
  0x37   :  { %1024 = vmatpush.bf16.msrb.mxu2 %v1848_v5  ;;  %v2060_v34 = vor.u32 %v2354_v31, %v2057_v33  ;;  %v1641_v36 = vld [vmem:[#allocation4 + $0x70] sm:$0xf0]  ;;  %v2282_v37 = vld [vmem:[#allocation4 + $0x164] sm:$0xf] }
  0x38   :  { %1038 = vmatpush.bf16.msrb.mxu3 %v1976_v6  ;;  %v1644_v38 = vor.u32 %v2250_v35, %v1641_v36  ;;  %v1769_v39 = vld [vmem:[#allocation4 + $0x170] sm:$0xf0]  ;;  %v2318_v41 = vld [vmem:[#allocation4 + $0x284] sm:$0xf] }
  0x39   :  { %1045 = vmatpush.bf16.msra.mxu0 %v1708_v60  ;;  %v1772_v40 = vor.u32 %v2282_v37, %v1769_v39  ;;  %v1913_v42 = vld [vmem:[#allocation4 + $0x290] sm:$0xf0]  ;;  %v2350_v44 = vld [vmem:[#allocation4 + $0x384] sm:$0xf]  ;;  %v2269_v39 = vld [vmem:[#allocation4 + $0xf4] sm:$0xf0] }
  0x3a   :  { %1059 = vmatpush.bf16.msra.mxu1 %v1836_v0  ;;  %v1916_v43 = vor.u32 %v2318_v41, %v1913_v42  ;;  %v2041_v45 = vld [vmem:[#allocation4 + $0x390] sm:$0xf0]  ;;  %v2246_v47 = vld [vmem:[#allocation4 + $0x44] sm:$0xf]  ;;  %v88_v41 = vperm.slane %v84_v25, 2 }
  0x3b   :  { %1073 = vmatpush.bf16.msra.mxu2 %v1964_v7  ;;  %v2044_v46 = vor.u32 %v2350_v44, %v2041_v45  ;;  %v1625_v48 = vld [vmem:[#allocation4 + $0x50] sm:$0xf0]  ;;  %v2278_v49 = vld [vmem:[#allocation4 + $0x144] sm:$0xf]  ;;  %v2301_v44 = vld [vmem:[#allocation4 + $0x1f4] sm:$0xf0] }
  0x3c   :  { %1087 = vmatpush.bf16.msra.mxu3 %v2092_v9  ;;  %v1628_v50 = vor.u32 %v2246_v47, %v1625_v48  ;;  %v1753_v51 = vld [vmem:[#allocation4 + $0x150] sm:$0xf0]  ;;  %v2314_v53 = vld [vmem:[#allocation4 + $0x264] sm:$0xf]  ;;  %v89_v45 = vperm.slane %v84_v25, 3 }
  0x3d   :  { %1046 = vmatpush.bf16.msra.mxu0 %v1692_v8  ;;  %v1756_v52 = vor.u32 %v2278_v49, %v1753_v51  ;;  %v1897_v54 = vld [vmem:[#allocation4 + $0x270] sm:$0xf0]  ;;  %v2346_v55 = vld [vmem:[#allocation4 + $0x364] sm:$0xf]  ;;  %v1695_v51 = vld [vmem:[#allocation4 + $0xc8] sm:$0xf] }
  0x3e   :  { %1060 = vmatpush.bf16.msra.mxu1 %v1820_v13  ;;  %v1900_v56 = vor.u32 %v2314_v53, %v1897_v54  ;;  %v2025_v57 = vld [vmem:[#allocation4 + $0x370] sm:$0xf0]  ;;  %v2242_v59 = vld [vmem:[#allocation4 + $0x24] sm:$0xf] }
  0x3f   :  { %1074 = vmatpush.bf16.msra.mxu2 %v1948_v19  ;;  %v2028_v58 = vor.u32 %v2346_v55, %v2025_v57  ;;  %v1609_v60 = vld [vmem:[#allocation4 + $0x30] sm:$0xf0]  ;;  %v2274_v62 = vld [vmem:[#allocation4 + $0x124] sm:$0xf]  ;;  %v1823_v55 = vld [vmem:[#allocation4 + $0x1c8] sm:$0xf] }
  0x40   :  { %1088 = vmatpush.bf16.msra.mxu3 %v2076_v21  ;;  %v1612_v61 = vor.u32 %v2242_v59, %v1609_v60  ;;  %v1737_v63 = vld [vmem:[#allocation4 + $0x130] sm:$0xf0]  ;;  %v2310_v1 = vld [vmem:[#allocation4 + $0x244] sm:$0xf] }
  0x41   :  { %1047 = vmatpush.bf16.msra.mxu0 %v1676_v20  ;;  %v1740_v0 = vor.u32 %v2274_v62, %v1737_v63  ;;  %v1881_v2 = vld [vmem:[#allocation4 + $0x250] sm:$0xf0]  ;;  %v2342_v3 = vld [vmem:[#allocation4 + $0x344] sm:$0xf]  ;;  %v1967_v62 = vld [vmem:[#allocation4 + $0x2e8] sm:$0xf] }
  0x42   :  { %1061 = vmatpush.bf16.msra.mxu1 %v1804_v22  ;;  %v1884_v4 = vor.u32 %v2310_v1, %v1881_v2  ;;  %v2009_v5 = vld [vmem:[#allocation4 + $0x350] sm:$0xf0]  ;;  %v2238_v7 = vld [vmem:[#allocation4 + $0x4] sm:$0xf]  ;;  %v2333_v63 = vld [vmem:[#allocation4 + $0x2f4] sm:$0xf0] }
  0x43   :  { %1075 = vmatpush.bf16.msra.mxu2 %v1932_v32  ;;  %v2012_v6 = vor.u32 %v2342_v3, %v2009_v5  ;;  %v1593_v8 = vld [vmem:[#allocation4 + $0x10] sm:$0xf0]  ;;  %v2270_v9 = vld [vmem:[#allocation4 + $0x104] sm:$0xf]  ;;  %v2365_v3 = vld [vmem:[#allocation4 + $0x3f4] sm:$0xf0] }
  0x44   :  { %1089 = vmatpush.bf16.msra.mxu3 %v2060_v34  ;;  %v1596_v10 = vor.u32 %v2238_v7, %v1593_v8  ;;  %v1721_v11 = vld [vmem:[#allocation4 + $0x110] sm:$0xf0]  ;;  %v2306_v13 = vld [vmem:[#allocation4 + $0x224] sm:$0xf]  ;;  %v2261_v5 = vld [vmem:[#allocation4 + $0xb4] sm:$0xf0] }
  0x45   :  { %1048 = vmatpush.bf16.msra.mxu0 %v1660_v27  ;;  %v1724_v12 = vor.u32 %v2270_v9, %v1721_v11  ;;  %v1865_v14 = vld [vmem:[#allocation4 + $0x230] sm:$0xf0]  ;;  %v2338_v15 = vld [vmem:[#allocation4 + $0x324] sm:$0xf]  ;;  %v86_v27 = vperm.slane %v84_v25, 0 }
  0x46   :  { %1062 = vmatpush.bf16.msra.mxu1 %v1788_v28  ;;  %v1993_v16 = vld [vmem:[#allocation4 + $0x330] sm:$0xf0]  ;;  %v1868_v17 = vor.u32 %v2306_v13, %v1865_v14  ;;  %v2302_v19 = vld [vmem:[#allocation4 + $0x204] sm:$0xf]  ;;  %v1807_v8 = vld [vmem:[#allocation4 + $0x1a8] sm:$0xf] }
  0x47   :  { %1076 = vmatpush.bf16.msra.mxu2 %v1916_v43  ;;  %v1996_v18 = vor.u32 %v2338_v15, %v1993_v16  ;;  %v1849_v20 = vld [vmem:[#allocation4 + $0x210] sm:$0xf0]  ;;  %v2334_v22 = vld [vmem:[#allocation4 + $0x304] sm:$0xf]  ;;  %v1839_v43 = vld [vmem:[#allocation4 + $0x1e8] sm:$0xf] }
  0x48   :  { %1090 = vmatpush.bf16.msra.mxu3 %v2044_v46  ;;  %v1852_v21 = vor.u32 %v2302_v19, %v1849_v20  ;;  %v1977_v23 = vld [vmem:[#allocation4 + $0x310] sm:$0xf0]  ;;  %v2293_v9 = vld [vmem:[#allocation4 + $0x1b4] sm:$0xf0]  ;;  %v1951_v16 = vld [vmem:[#allocation4 + $0x2c8] sm:$0xf] }
  0x49   :  { %1049 = vmatpush.bf16.msra.mxu0 %v1644_v38  ;;  %v1980_v24 = vor.u32 %v2334_v22, %v1977_v23  ;;  %v1711_v38 = vld [vmem:[#allocation4 + $0xe8] sm:$0xf]  ;;  %v1808_v20 = vor.u32 %v2293_v9, %v1807_v8  ;;  %v2257_v23 = vld [vmem:[#allocation4 + $0x94] sm:$0xf0] }
  0x4a   :  { %1063 = vmatpush.bf16.msra.mxu1 %v1772_v40  ;;  %v1712_v48 = vor.u32 %v2269_v39, %v1711_v38  ;;  %v1663_v22 = vld [vmem:[#allocation4 + $0x88] sm:$0xf]  ;;  %v2289_v25 = vld [vmem:[#allocation4 + $0x194] sm:$0xf0] }
  0x4b   :  { %1077 = vmatpush.bf16.msra.mxu2 %v1900_v56  ;;  %v2297_v56 = vld [vmem:[#allocation4 + $0x1d4] sm:$0xf0]  ;;  %v1599_v8 = vld [vmem:[#allocation4 + $0x8] sm:$0xf] }
  0x4c   :  { %1091 = vmatpush.bf16.msra.mxu3 %v2028_v58  ;;  %v1824_v2 = vor.u32 %v2297_v56, %v1823_v55  ;;  %v2317_v55 = vld [vmem:[#allocation4 + $0x274] sm:$0xf0] }
  0x4d   :  { %1050 = vmatpush.bf16.msra.mxu0 %v1628_v50  ;;  %v1840_v50 = vor.u32 %v2301_v44, %v1839_v43  ;;  %v2047_v44 = vld [vmem:[#allocation4 + $0x388] sm:$0xf]  ;;  %v2241_v9 = vld [vmem:[#allocation4 + $0x14] sm:$0xf0] }
  0x4e   :  { %1064 = vmatpush.bf16.msra.mxu1 %v1756_v52  ;;  %v2265_v52 = vld [vmem:[#allocation4 + $0xd4] sm:$0xf0] }
  0x4f   :  { %1078 = vmatpush.bf16.msra.mxu2 %v1884_v4  ;;  %v1679_v4 = vld [vmem:[#allocation4 + $0xa8] sm:$0xf] }
  0x50   :  { %1092 = vmatpush.bf16.msra.mxu3 %v2012_v6  ;;  %v1680_v15 = vor.u32 %v2261_v5, %v1679_v4  ;;  %v2015_v4 = vld [vmem:[#allocation4 + $0x348] sm:$0xf] }
  0x51   :  { %1051 = vmatpush.bf16.msra.mxu0 %v1612_v61  ;;  %v1696_v61 = vor.u32 %v2265_v52, %v1695_v51 }
  0x52   :  { %1065 = vmatpush.bf16.msra.mxu1 %v1740_v0  ;;  %v2095_v0 = vld [vmem:[#allocation4 + $0x3e8] sm:$0xf] }
  0x53   :  { %1079 = vmatpush.bf16.msra.mxu2 %v1868_v17  ;;  %v2096_v14 = vor.u32 %v2365_v3, %v2095_v0  ;;  %v2329_v17 = vld [vmem:[#allocation4 + $0x2d4] sm:$0xf0] }
  0x54   :  { %1093 = vmatpush.bf16.msra.mxu3 %v1996_v18  ;;  %v2079_v18 = vld [vmem:[#allocation4 + $0x3c8] sm:$0xf]  ;;  %v2313_v3 = vld [vmem:[#allocation4 + $0x254] sm:$0xf0] }
  0x55   :  { %1052 = vmatpush.bf16.msra.mxu0 %v1596_v10 }
  0x56   :  { %1066 = vmatpush.bf16.msra.mxu1 %v1724_v12  ;;  %v1968_v12 = vor.u32 %v2333_v63, %v1967_v62  ;;  %v1743_v62 = vld [vmem:[#allocation4 + $0x128] sm:$0xf]  ;;  %v2277_v63 = vld [vmem:[#allocation4 + $0x134] sm:$0xf0] }
  0x57   :  { %1080 = vmatpush.bf16.msra.mxu2 %v1852_v21  ;;  %v2361_v21 = vld [vmem:[#allocation4 + $0x3d4] sm:$0xf0] }
  0x58   :  { %1094 = vmatpush.bf16.msra.mxu3 %v1980_v24  ;;  %v1791_v24 = vld [vmem:[#allocation4 + $0x188] sm:$0xf] }
  0x95   :  { %v152_v26 = vpop.f32.mrf.mxu0 }
  0x96   :  { %v166_v28 = vpop.f32.mrf.mxu1  ;;  %v153_v30 = vadd.f32 %v152_v26, %v86_v27  ;;  %v1952_v26 = vor.u32 %v2329_v17, %v1951_v16  ;;  %v2299_v16 = vld [vmem:[#allocation4 + $0x1ec] sm:$0xf]  ;;  %v1841_v17 = vld [vmem:[#allocation4 + $0x1f8] sm:$0xf0] }
  0x97   :  { %v167_v31 = vadd.f32 %v166_v28, %v87_v29  ;;  %v1664_v28 = vor.u32 %v2257_v23, %v1663_v22  ;;  %v1600_v22 = vor.u32 %v2241_v9, %v1599_v8  ;;  %v2251_v8 = vld [vmem:[#allocation4 + $0x6c] sm:$0xf]  ;;  %v1649_v9 = vld [vmem:[#allocation4 + $0x78] sm:$0xf0] }
  0x98   :  { %v199_v35 = vmax.f32 %v153_v30, 0.0  ;;  %v2325_v30 = vld [vmem:[#allocation4 + $0x2b4] sm:$0xf0] }
  0x99   :  { %v200_v40 = vmax.f32 %v167_v31, 0.0  ;;  %v1792_v31 = vor.u32 %v2289_v25, %v1791_v24  ;;  %v1999_v24 = vld [vmem:[#allocation4 + $0x328] sm:$0xf]  ;;  %v2341_v25 = vld [vmem:[#allocation4 + $0x334] sm:$0xf0] }
  0x9d   :  { %v180_v32 = vpop.f32.mrf.mxu2  ;;  %v154_v34 = vpop.f32.mrf.mxu0 }
  0x9e   :  { %v194_v33 = vpop.f32.mrf.mxu3  ;;  %v155_v36 = vadd.f32 %v154_v34, %v86_v27  ;;  %v168_v37 = vpop.f32.mrf.mxu1  ;;  %v181_v53 = vadd.f32 %v180_v32, %v88_v41  ;;  %v2080_v27 = vor.u32 %v2361_v21, %v2079_v18  ;;  %v2063_v32 = vld [vmem:[#allocation4 + $0x3a8] sm:$0xf]  ;;  %v2309_v21 = vld [vmem:[#allocation4 + $0x234] sm:$0xf0] }
  0x9f   :  { %v169_v42 = vadd.f32 %v168_v37, %v87_v29  ;;  %v195_v57 = vadd.f32 %v194_v33, %v89_v45  ;;  %v1935_v29 = vld [vmem:[#allocation4 + $0x2a8] sm:$0xf]  ;;  %v2357_v33 = vld [vmem:[#allocation4 + $0x3b4] sm:$0xf0] }
  0xa0   :  { %v203_v46 = vmax.f32 %v155_v36, 0.0  ;;  %v201_v6 = vmax.f32 %v181_v53, 0.0  ;;  %v1647_v34 = vld [vmem:[#allocation4 + $0x68] sm:$0xf]  ;;  %v2285_v37 = vld [vmem:[#allocation4 + $0x174] sm:$0xf0]  ;;  %v1936_v38 = vor.u32 %v2325_v30, %v1935_v29  ;;  %v2064_v39 = vor.u32 %v2357_v33, %v2063_v32 }
  0xa1   :  { %v204_v47 = vmax.f32 %v169_v42, 0.0  ;;  %v202_v10 = vmax.f32 %v195_v57, 0.0  ;;  %v1775_v36 = vld [vmem:[#allocation4 + $0x168] sm:$0xf]  ;;  %v1697_v30 = vld [vmem:[#allocation4 + $0xd8] sm:$0xf0]  ;;  %v2000_v33 = vor.u32 %v2341_v25, %v1999_v24 }
  0xa2   :  { %v2548_v49 = vpack.c.bf16 %v203_v46, %v199_v35  ;;  %v2253_v35 = vld [vmem:[#allocation4 + $0x74] sm:$0xf0]  ;;  %v1776_v43 = vor.u32 %v2285_v37, %v1775_v36  ;;  %v1631_v46 = vld [vmem:[#allocation4 + $0x48] sm:$0xf]  ;;  %v1825_v32 = vld [vmem:[#allocation4 + $0x1d8] sm:$0xf0] }
  0xa3   :  { %v2550_v54 = vpack.c.bf16 %v204_v47, %v200_v40  ;;  %v1919_v40 = vld [vmem:[#allocation4 + $0x288] sm:$0xf]  ;;  %v1648_v42 = vor.u32 %v2253_v35, %v1647_v34  ;;  %v2249_v47 = vld [vmem:[#allocation4 + $0x54] sm:$0xf0]  ;;  %v2279_v24 = vld [vmem:[#allocation4 + $0x14c] sm:$0xf] }
  0xa4   :  { %997 = vmatmul.bf16.vlgmr.msrb.gmra.mxu0 %v2548_v49  ;;  %v1903_v53 = vld [vmem:[#allocation4 + $0x268] sm:$0xf]  ;;  %v1632_v56 = vor.u32 %v2249_v47, %v1631_v46  ;;  %v2305_v35 = vld [vmem:[#allocation4 + $0x214] sm:$0xf0]  ;;  %v1681_v46 = vld [vmem:[#allocation4 + $0xb8] sm:$0xf0] }
  0xa5   :  { %v182_v58 = vpop.f32.mrf.mxu2  ;;  %1011 = vmatmul.bf16.vlgmr.msrb.gmra.mxu1 %v2550_v54  ;;  %1101 = vmatpush.bf16.msrb.mxu0 %v1712_v48  ;;  %v1759_v48 = vld [vmem:[#allocation4 + $0x148] sm:$0xf]  ;;  %v1904_v0 = vor.u32 %v2317_v55, %v1903_v53  ;;  %v2337_v37 = vld [vmem:[#allocation4 + $0x314] sm:$0xf0]  ;;  %v2291_v47 = vld [vmem:[#allocation4 + $0x1ac] sm:$0xf] }
  0xa6   :  { %v183_v59 = vadd.f32 %v182_v58, %v88_v41  ;;  %v196_v60 = vpop.f32.mrf.mxu3  ;;  %1115 = vmatpush.bf16.msrb.mxu1 %v1840_v50  ;;  %v2321_v41 = vld [vmem:[#allocation4 + $0x294] sm:$0xf0]  ;;  %v2031_v58 = vld [vmem:[#allocation4 + $0x368] sm:$0xf]  ;;  %v2327_v53 = vld [vmem:[#allocation4 + $0x2cc] sm:$0xf] }
  0xa7   :  { %v197_v1 = vadd.f32 %v196_v60, %v89_v45  ;;  %v2353_v45 = vld [vmem:[#allocation4 + $0x394] sm:$0xf0]  ;;  %v1920_v51 = vor.u32 %v2321_v41, %v1919_v40  ;;  %v1615_v60 = vld [vmem:[#allocation4 + $0x28] sm:$0xf]  ;;  %v1953_v55 = vld [vmem:[#allocation4 + $0x2d8] sm:$0xf0] }
  0xa8   :  { %v205_v7 = vmax.f32 %v183_v59, 0.0  ;;  %v2281_v50 = vld [vmem:[#allocation4 + $0x154] sm:$0xf0]  ;;  %v2048_v52 = vor.u32 %v2353_v45, %v2047_v44  ;;  %v1855_v34 = vld [vmem:[#allocation4 + $0x208] sm:$0xf] }
  0xa9   :  { %v206_v11 = vmax.f32 %v197_v1, 0.0  ;;  %1102 = vmatpush.bf16.msrb.mxu0 %v1696_v61  ;;  %v1760_v57 = vor.u32 %v2281_v50, %v1759_v48  ;;  %v2349_v59 = vld [vmem:[#allocation4 + $0x374] sm:$0xf0]  ;;  %v1983_v36 = vld [vmem:[#allocation4 + $0x308] sm:$0xf]  ;;  %v1856_v45 = vor.u32 %v2305_v35, %v1855_v34 }
  0xaa   :  { %v2554_v13 = vpack.c.bf16 %v205_v7, %v201_v6  ;;  %1116 = vmatpush.bf16.msrb.mxu1 %v1824_v2  ;;  %v2245_v61 = vld [vmem:[#allocation4 + $0x34] sm:$0xf0]  ;;  %v2032_v1 = vor.u32 %v2349_v59, %v2031_v58  ;;  %v1887_v2 = vld [vmem:[#allocation4 + $0x248] sm:$0xf]  ;;  %v1744_v6 = vor.u32 %v2277_v63, %v1743_v62  ;;  %v2259_v44 = vld [vmem:[#allocation4 + $0xac] sm:$0xf]  ;;  %v1984_v50 = vor.u32 %v2337_v37, %v1983_v36 }
  0xab   :  { %v2556_v19 = vpack.c.bf16 %v206_v11, %v202_v10  ;;  %v1616_v5 = vor.u32 %v2245_v61, %v1615_v60  ;;  %v2345_v7 = vld [vmem:[#allocation4 + $0x354] sm:$0xf0]  ;;  %v1727_v10 = vld [vmem:[#allocation4 + $0x108] sm:$0xf]  ;;  %v1809_v48 = vld [vmem:[#allocation4 + $0x1b8] sm:$0xf0] }
  0xac   :  { %1025 = vmatmul.bf16.vlgmr.msrb.gmra.mxu2 %v2554_v13  ;;  %v2273_v11 = vld [vmem:[#allocation4 + $0x114] sm:$0xf0]  ;;  %v2016_v18 = vor.u32 %v2345_v7, %v2015_v4  ;;  %v2359_v58 = vld [vmem:[#allocation4 + $0x3cc] sm:$0xf]  ;;  %v2081_v59 = vld [vmem:[#allocation4 + $0x3d8] sm:$0xf0] }
  0xad   :  { %1039 = vmatmul.bf16.vlgmr.msrb.gmra.mxu3 %v2556_v19  ;;  %1129 = vmatpush.bf16.msrb.mxu2 %v1968_v12  ;;  %v2267_v12 = vld [vmem:[#allocation4 + $0xec] sm:$0xf]  ;;  %v1728_v23 = vor.u32 %v2273_v11, %v1727_v10  ;;  %v1665_v61 = vld [vmem:[#allocation4 + $0x98] sm:$0xf0] }
  0xae   :  { %1143 = vmatpush.bf16.msrb.mxu3 %v2096_v14  ;;  %1103 = vmatpush.bf16.msrb.mxu0 %v1680_v15  ;;  %v1888_v14 = vor.u32 %v2313_v3, %v1887_v2  ;;  %v1713_v15 = vld [vmem:[#allocation4 + $0xf8] sm:$0xf0]  ;;  %v2255_v60 = vld [vmem:[#allocation4 + $0x8c] sm:$0xf] }
  0xaf   :  { %1117 = vmatpush.bf16.msrb.mxu1 %v1808_v20  ;;  %v1871_v20 = vld [vmem:[#allocation4 + $0x228] sm:$0xf]  ;;  %v2287_v62 = vld [vmem:[#allocation4 + $0x18c] sm:$0xf]  ;;  %v1793_v63 = vld [vmem:[#allocation4 + $0x198] sm:$0xf0]  ;;  %v1668_v4 = vor.u32 %v2255_v60, %v1665_v61 }
  0xb0   :  { %v1872_v29 = vor.u32 %v2309_v21, %v1871_v20  ;;  %v2323_v2 = vld [vmem:[#allocation4 + $0x2ac] sm:$0xf]  ;;  %v1937_v3 = vld [vmem:[#allocation4 + $0x2b8] sm:$0xf0] }
  0xb1   :  { %1130 = vmatpush.bf16.msrb.mxu2 %v1952_v26  ;;  %v1716_v26 = vor.u32 %v2267_v12, %v1713_v15  ;;  %v2065_v7 = vld [vmem:[#allocation4 + $0x3b8] sm:$0xf0]  ;;  %v2283_v10 = vld [vmem:[#allocation4 + $0x16c] sm:$0xf]  ;;  %v1940_v12 = vor.u32 %v2323_v2, %v1937_v3 }
  0xb2   :  { %1144 = vmatpush.bf16.msrb.mxu3 %v2080_v27  ;;  %1104 = vmatpush.bf16.msrb.mxu0 %v1664_v28  ;;  %v1844_v27 = vor.u32 %v2299_v16, %v1841_v17  ;;  %v2263_v28 = vld [vmem:[#allocation4 + $0xcc] sm:$0xf]  ;;  %v1777_v11 = vld [vmem:[#allocation4 + $0x178] sm:$0xf0]  ;;  %v1652_v17 = vor.u32 %v2251_v8, %v1649_v9 }
  0xb3   :  { %1118 = vmatpush.bf16.msrb.mxu1 %v1792_v31  ;;  %v2295_v31 = vld [vmem:[#allocation4 + $0x1cc] sm:$0xf]  ;;  %v1700_v40 = vor.u32 %v2263_v28, %v1697_v30  ;;  %v1921_v16 = vld [vmem:[#allocation4 + $0x298] sm:$0xf0] }
  0xb4   :  { %1053 = vmatmul.bf16.vlgmr.msra.gmra.mxu0 %v2548_v49  ;;  %v1828_v41 = vor.u32 %v2295_v31, %v1825_v32  ;;  %v2319_v15 = vld [vmem:[#allocation4 + $0x28c] sm:$0xf]  ;;  %v2049_v21 = vld [vmem:[#allocation4 + $0x398] sm:$0xf0] }
  0xb5   :  { %1131 = vmatpush.bf16.msrb.mxu2 %v1936_v38  ;;  %1067 = vmatmul.bf16.vlgmr.msra.gmra.mxu1 %v2550_v54  ;;  %v2331_v38 = vld [vmem:[#allocation4 + $0x2ec] sm:$0xf]  ;;  %v1761_v25 = vld [vmem:[#allocation4 + $0x158] sm:$0xf0] }
  0xb6   :  { %1145 = vmatpush.bf16.msrb.mxu3 %v2064_v39  ;;  %1105 = vmatpush.bf16.msrb.mxu0 %v1648_v42  ;;  %v1969_v39 = vld [vmem:[#allocation4 + $0x2f8] sm:$0xf0]  ;;  %v2363_v42 = vld [vmem:[#allocation4 + $0x3ec] sm:$0xf]  ;;  %v1764_v31 = vor.u32 %v2279_v24, %v1761_v25  ;;  %v2374_v25 = vld [vmem:[#allocation6 + $0x40] sm:$0xff] }
  0xb7   :  { %1119 = vmatpush.bf16.msrb.mxu1 %v1776_v43  ;;  %v2097_v43 = vld [vmem:[#allocation4 + $0x3f8] sm:$0xf0]  ;;  %v2351_v20 = vld [vmem:[#allocation4 + $0x38c] sm:$0xf] }
  0xb8   :  { %v2315_v28 = vld [vmem:[#allocation4 + $0x26c] sm:$0xf]  ;;  %v1617_v35 = vld [vmem:[#allocation4 + $0x38] sm:$0xf0] }
  0xb9   :  { %1132 = vmatpush.bf16.msrb.mxu2 %v1920_v51  ;;  %v1972_v51 = vor.u32 %v2331_v38, %v1969_v39  ;;  %v2347_v32 = vld [vmem:[#allocation4 + $0x36c] sm:$0xf]  ;;  %v1745_v37 = vld [vmem:[#allocation4 + $0x138] sm:$0xf0] }
  0xba   :  { %1146 = vmatpush.bf16.msrb.mxu3 %v2048_v52  ;;  %1106 = vmatpush.bf16.msrb.mxu0 %v1632_v56  ;;  %v2100_v52 = vor.u32 %v2363_v42, %v2097_v43  ;;  %v1684_v56 = vor.u32 %v2259_v44, %v1681_v46  ;;  %v2243_v34 = vld [vmem:[#allocation4 + $0x2c] sm:$0xf]  ;;  %v2373_v60 = vld [vmem:[#allocation6 + $0x38] sm:$0xff] }
  0xbb   :  { %1120 = vmatpush.bf16.msrb.mxu1 %v1760_v57  ;;  %v1812_v57 = vor.u32 %v2291_v47, %v1809_v48  ;;  %v2275_v36 = vld [vmem:[#allocation4 + $0x12c] sm:$0xf]  ;;  %v1620_v42 = vor.u32 %v2243_v34, %v1617_v35  ;;  %v1601_v47 = vld [vmem:[#allocation4 + $0x18] sm:$0xf0] }
  0xbc   :  { %1081 = vmatmul.bf16.vlgmr.msra.gmra.mxu2 %v2554_v13  ;;  %v1748_v43 = vor.u32 %v2275_v36, %v1745_v37  ;;  %v2343_v44 = vld [vmem:[#allocation4 + $0x34c] sm:$0xf]  ;;  %v1985_v2 = vld [vmem:[#allocation4 + $0x318] sm:$0xf0]  ;;  %v2384_v36 = vld [vmem:[#allocation6 + $0x90] sm:$0xff] }
  0xbd   :  { %1095 = vmatmul.bf16.vlgmr.msra.gmra.mxu3 %v2556_v19  ;;  %1133 = vmatpush.bf16.msrb.mxu2 %v1904_v0  ;;  %v1956_v0 = vor.u32 %v2327_v53, %v1953_v55  ;;  %v2239_v46 = vld [vmem:[#allocation4 + $0xc] sm:$0xf]  ;;  %v1873_v55 = vld [vmem:[#allocation4 + $0x238] sm:$0xf0] }
  0xbe   :  { %1147 = vmatpush.bf16.msrb.mxu3 %v2032_v1  ;;  %1107 = vmatpush.bf16.msrb.mxu0 %v1616_v5  ;;  %v2084_v1 = vor.u32 %v2359_v58, %v2081_v59  ;;  %v1796_v5 = vor.u32 %v2287_v62, %v1793_v63  ;;  %v2271_v48 = vld [vmem:[#allocation4 + $0x10c] sm:$0xf]  ;;  %v2001_v59 = vld [vmem:[#allocation4 + $0x338] sm:$0xf0] }
  0xbf   :  { %1121 = vmatpush.bf16.msrb.mxu1 %v1744_v6  ;;  %v2355_v6 = vld [vmem:[#allocation4 + $0x3ac] sm:$0xf]  ;;  %v2369_v8 = vld [vmem:[#allocation6 + $0x18] sm:$0xff] }
  0xc0   :  { %v2307_v53 = vld [vmem:[#allocation4 + $0x22c] sm:$0xf]  ;;  %v2381_v9 = vld [vmem:[#allocation6 + $0x78] sm:$0xff] }
  0xc1   :  { %1134 = vmatpush.bf16.msrb.mxu2 %v1888_v14  ;;  %v2068_v14 = vor.u32 %v2355_v6, %v2065_v7  ;;  %v2339_v58 = vld [vmem:[#allocation4 + $0x32c] sm:$0xf]  ;;  %v1876_v61 = vor.u32 %v2307_v53, %v1873_v55  ;;  %v2370_v7 = vld [vmem:[#allocation6 + $0x20] sm:$0xff] }
  0xc2   :  { %1148 = vmatpush.bf16.msrb.mxu3 %v2016_v18  ;;  %1108 = vmatpush.bf16.msrb.mxu0 %v1600_v22  ;;  %v1780_v18 = vor.u32 %v2283_v10, %v1777_v11  ;;  %v2247_v22 = vld [vmem:[#allocation4 + $0x4c] sm:$0xf]  ;;  %v2004_v62 = vor.u32 %v2339_v58, %v2001_v59  ;;  %v2380_v10 = vld [vmem:[#allocation6 + $0x70] sm:$0xff] }
  0xc3   :  { %1122 = vmatpush.bf16.msrb.mxu1 %v1728_v23  ;;  %v1633_v23 = vld [vmem:[#allocation4 + $0x58] sm:$0xf0]  ;;  %v2303_v63 = vld [vmem:[#allocation4 + $0x20c] sm:$0xf] }
  0xc4   :  { %v1636_v30 = vor.u32 %v2247_v22, %v1633_v23  ;;  %v2371_v6 = vld [vmem:[#allocation6 + $0x28] sm:$0xff] }
  0xc5   :  { %1135 = vmatpush.bf16.msrb.mxu2 %v1872_v29  ;;  %1109 = vmatmul.bf16.vlgmr.msrb.gmra.mxu0 %v2548_v49  ;;  %v1905_v29 = vld [vmem:[#allocation4 + $0x278] sm:$0xf0]  ;;  %v2379_v11 = vld [vmem:[#allocation6 + $0x68] sm:$0xff] }
  0xc6   :  { %1157 = vmatpush.bf16.msra.mxu0 %v1716_v26  ;;  %1149 = vmatpush.bf16.msrb.mxu3 %v2000_v33  ;;  %v1924_v26 = vor.u32 %v2319_v15, %v1921_v16  ;;  %v2033_v33 = vld [vmem:[#allocation4 + $0x378] sm:$0xf0]  ;;  %v1908_v38 = vor.u32 %v2315_v28, %v1905_v29  ;;  %v2387_v22 = vld [vmem:[#allocation6 + $0xa8] sm:$0xff] }
  0xc7   :  { %1171 = vmatpush.bf16.msra.mxu1 %v1844_v27  ;;  %v2052_v27 = vor.u32 %v2351_v20, %v2049_v21  ;;  %v2036_v39 = vor.u32 %v2347_v32, %v2033_v33  ;;  %v2575_v20 = vld [vmem:[%s2594_s4] sm:$0xf]  ;;  %v2375_v21 = vld [vmem:[#allocation6 + $0x48] sm:$0xff] }
  0xc8   :  { %1123 = vmatmul.bf16.vlgmr.msrb.gmra.mxu1 %v2550_v54  ;;  %v341_v23 = vperm.slane %v2575_v20, 0 }
  0xc9   :  { %1136 = vmatpush.bf16.msrb.mxu2 %v1856_v45  ;;  %v2017_v45 = vld [vmem:[#allocation4 + $0x358] sm:$0xf0] }
  0xca   :  { %1158 = vmatpush.bf16.msra.mxu0 %v1700_v40  ;;  %1150 = vmatpush.bf16.msrb.mxu3 %v1984_v50  ;;  %v2311_v40 = vld [vmem:[#allocation4 + $0x24c] sm:$0xf]  ;;  %v1729_v50 = vld [vmem:[#allocation4 + $0x118] sm:$0xf0] }
  0xcb   :  { %1172 = vmatpush.bf16.msra.mxu1 %v1828_v41  ;;  %v1889_v41 = vld [vmem:[#allocation4 + $0x258] sm:$0xf0] }
  0xcc   :  { %1137 = vmatmul.bf16.vlgmr.msrb.gmra.mxu2 %v2554_v13 }
  0xcd   :  { %1185 = vmatpush.bf16.msra.mxu2 %v1972_v51  ;;  %1151 = vmatmul.bf16.vlgmr.msrb.gmra.mxu3 %v2556_v19  ;;  %v1892_v51 = vor.u32 %v2311_v40, %v1889_v41 }
  0xce   :  { %1199 = vmatpush.bf16.msra.mxu3 %v2100_v52  ;;  %1159 = vmatpush.bf16.msra.mxu0 %v1684_v56  ;;  %v2020_v52 = vor.u32 %v2343_v44, %v2017_v45  ;;  %v1604_v56 = vor.u32 %v2239_v46, %v1601_v47  ;;  %v342_v44 = vperm.slane %v2575_v20, 1 }
  0xcf   :  { %1173 = vmatpush.bf16.msra.mxu1 %v1812_v57  ;;  %v1732_v57 = vor.u32 %v2271_v48, %v1729_v50  ;;  %v2382_v50 = vld [vmem:[#allocation6 + $0x80] sm:$0xff] }
  0xd1   :  { %1186 = vmatpush.bf16.msra.mxu2 %v1956_v0  ;;  %v1857_v0 = vld [vmem:[#allocation4 + $0x218] sm:$0xf0] }
  0xd2   :  { %1200 = vmatpush.bf16.msra.mxu3 %v2084_v1  ;;  %1160 = vmatpush.bf16.msra.mxu0 %v1668_v4  ;;  %v2335_v1 = vld [vmem:[#allocation4 + $0x30c] sm:$0xf]  ;;  %v1860_v3 = vor.u32 %v2303_v63, %v1857_v0 }
  0xd3   :  { %1174 = vmatpush.bf16.msra.mxu1 %v1796_v5  ;;  %v1988_v4 = vor.u32 %v2335_v1, %v1985_v2  ;;  %v2372_v5 = vld [vmem:[#allocation6 + $0x30] sm:$0xff] }
  0xd5   :  { %1187 = vmatpush.bf16.msra.mxu2 %v1940_v12  ;;  %v2377_v12 = vld [vmem:[#allocation6 + $0x58] sm:$0xff] }
  0xd6   :  { %1201 = vmatpush.bf16.msra.mxu3 %v2068_v14  ;;  %1161 = vmatpush.bf16.msra.mxu0 %v1652_v17  ;;  %v2389_v14 = vld [vmem:[#allocation6 + $0xb8] sm:$0xff]  ;;  %v2376_v17 = vld [vmem:[#allocation6 + $0x50] sm:$0xff] }
  0xd7   :  { %1175 = vmatpush.bf16.msra.mxu1 %v1780_v18  ;;  %v2388_v18 = vld [vmem:[#allocation6 + $0xb0] sm:$0xff] }
  0xd9   :  { %1188 = vmatpush.bf16.msra.mxu2 %v1924_v26  ;;  %v2386_v26 = vld [vmem:[#allocation6 + $0xa0] sm:$0xff] }
  0xda   :  { %1202 = vmatpush.bf16.msra.mxu3 %v2052_v27  ;;  %1162 = vmatpush.bf16.msra.mxu0 %v1636_v30 }
  0xdb   :  { %1176 = vmatpush.bf16.msra.mxu1 %v1764_v31  ;;  %v2385_v31 = vld [vmem:[#allocation6 + $0x98] sm:$0xff] }
  0xdd   :  { %1189 = vmatpush.bf16.msra.mxu2 %v1908_v38 }
  0xde   :  { %1203 = vmatpush.bf16.msra.mxu3 %v2036_v39  ;;  %1163 = vmatpush.bf16.msra.mxu0 %v1620_v42 }
  0xdf   :  { %1177 = vmatpush.bf16.msra.mxu1 %v1748_v43  ;;  %v2383_v43 = vld [vmem:[#allocation6 + $0x88] sm:$0xff] }
  0xe1   :  { %1190 = vmatpush.bf16.msra.mxu2 %v1892_v51  ;;  %v2397_v51 = vld [vmem:[#allocation6 + $0xf8] sm:$0xff] }
  0xe2   :  { %1204 = vmatpush.bf16.msra.mxu3 %v2020_v52  ;;  %1164 = vmatpush.bf16.msra.mxu0 %v1604_v56 }
  0xe3   :  { %1178 = vmatpush.bf16.msra.mxu1 %v1732_v57  ;;  %v2396_v57 = vld [vmem:[#allocation6 + $0xf0] sm:$0xff] }
  0xe5   :  { %1191 = vmatpush.bf16.msra.mxu2 %v1876_v61  ;;  %1165 = vmatmul.bf16.vlgmr.msra.gmra.mxu0 %v2548_v49  ;;  %v2368_v49 = vld [vmem:[#allocation6 + $0x10] sm:$0xff]  ;;  %v2395_v61 = vld [vmem:[#allocation6 + $0xe8] sm:$0xff] }
  0xe6   :  { %1485 = vmatpush.bf16.msrb.mxu0 %v2373_v60  ;;  %1205 = vmatpush.bf16.msra.mxu3 %v2004_v62 }
  0xe7   :  { %1179 = vmatmul.bf16.vlgmr.msra.gmra.mxu1 %v2550_v54  ;;  %v2367_v54 = vld [vmem:[#allocation6 + $0x8] sm:$0xff] }
  0xe8   :  { %1499 = vmatpush.bf16.msrb.mxu1 %v2381_v9 }
  0xe9   :  { %1192 = vmatpush.bf16.msra.mxu2 %v1860_v3 }
  0xea   :  { %1206 = vmatpush.bf16.msra.mxu3 %v1988_v4  ;;  %1486 = vmatpush.bf16.msrb.mxu0 %v2372_v5  ;;  %v2394_v5 = vld [vmem:[#allocation6 + $0xe0] sm:$0xff] }
  0xec   :  { %1193 = vmatmul.bf16.vlgmr.msra.gmra.mxu2 %v2554_v13  ;;  %1500 = vmatpush.bf16.msrb.mxu1 %v2380_v10  ;;  %v2366_v13 = vld [vmem:[#allocation6] sm:$0xff]  ;;  %v2393_v10 = vld [vmem:[#allocation6 + $0xd8] sm:$0xff] }
  0xed   :  { %1207 = vmatmul.bf16.vlgmr.msra.gmra.mxu3 %v2556_v19  ;;  %v2378_v19 = vld [vmem:[#allocation6 + $0x60] sm:$0xff]  ;;  %1513 = vmatpush.bf16.msrb.mxu2 %v2389_v14  ;;  %v2392_v14 = vld [vmem:[#allocation6 + $0xd0] sm:$0xff] }
  0xee   :  { %1487 = vmatpush.bf16.msrb.mxu0 %v2371_v6  ;;  %1527 = vmatpush.bf16.msrb.mxu3 %v2397_v51 }
  0xf0   :  { %1501 = vmatpush.bf16.msrb.mxu1 %v2379_v11 }
  0xf1   :  { %1514 = vmatpush.bf16.msrb.mxu2 %v2388_v18  ;;  %v2391_v18 = vld [vmem:[#allocation6 + $0xc8] sm:$0xff] }
  0xf2   :  { %1488 = vmatpush.bf16.msrb.mxu0 %v2370_v7  ;;  %1528 = vmatpush.bf16.msrb.mxu3 %v2396_v57  ;;  %v343_v7 = vperm.slane %v2575_v20, 2 }
  0xf4   :  { %1502 = vmatpush.bf16.msrb.mxu1 %v2378_v19 }
  0xf5   :  { %1515 = vmatpush.bf16.msrb.mxu2 %v2387_v22 }
  0xf6   :  { %1489 = vmatpush.bf16.msrb.mxu0 %v2369_v8  ;;  %1529 = vmatpush.bf16.msrb.mxu3 %v2395_v61 }
  0xf8   :  { %1503 = vmatpush.bf16.msrb.mxu1 %v2377_v12 }
  0xf9   :  { %1516 = vmatpush.bf16.msrb.mxu2 %v2386_v26  ;;  %v2390_v26 = vld [vmem:[#allocation6 + $0xc0] sm:$0xff] }
  0xfa   :  { %1490 = vmatpush.bf16.msrb.mxu0 %v2368_v49  ;;  %1530 = vmatpush.bf16.msrb.mxu3 %v2394_v5 }
  0xfc   :  { %1504 = vmatpush.bf16.msrb.mxu1 %v2376_v17 }
  0xfd   :  { %1517 = vmatpush.bf16.msrb.mxu2 %v2385_v31 }
  0xfe   :  { %1491 = vmatpush.bf16.msrb.mxu0 %v2367_v54  ;;  %1531 = vmatpush.bf16.msrb.mxu3 %v2393_v10 }
 0x100   :  { %1505 = vmatpush.bf16.msrb.mxu1 %v2375_v21 }
 0x101   :  { %1518 = vmatpush.bf16.msrb.mxu2 %v2384_v36 }
 0x102   :  { %1492 = vmatpush.bf16.msrb.mxu0 %v2366_v13  ;;  %1532 = vmatpush.bf16.msrb.mxu3 %v2392_v14 }
 0x104   :  { %1506 = vmatpush.bf16.msrb.mxu1 %v2374_v25 }
 0x105   :  { %1519 = vmatpush.bf16.msrb.mxu2 %v2383_v43 }
 0x106   :  { %1533 = vmatpush.bf16.msrb.mxu3 %v2391_v18 }
 0x109   :  { %1520 = vmatpush.bf16.msrb.mxu2 %v2382_v50 }
 0x10a   :  { %1534 = vmatpush.bf16.msrb.mxu3 %v2390_v26 }
 0x121   :  { %v998_v15 = vpop.f32.mrf.mxu0 }
 0x122   :  { %v1012_v16 = vpop.f32.mrf.mxu1  ;;  %v999_v27 = vadd.f32 %v998_v15, %v341_v23 }
 0x124   :  { %v1013_v32 = vadd.f32 %v1012_v16, %v999_v27 }
 0x129   :  { %v1000_v24 = vpop.f32.mrf.mxu0 }
 0x12a   :  { %v1014_v28 = vpop.f32.mrf.mxu1  ;;  %v1001_v33 = vadd.f32 %v1000_v24, %v341_v23 }
 0x12c   :  { %v1015_v37 = vadd.f32 %v1014_v28, %v1001_v33  ;;  %v344_v33 = vperm.slane %v2575_v20, 3 }
 0x12f   :  { %v1026_v29 = vpop.f32.mrf.mxu2 }
 0x130   :  { %v1040_v30 = vpop.f32.mrf.mxu3  ;;  %v1027_v35 = vadd.f32 %v1026_v29, %v1013_v32 }
 0x131   :  { %v1054_v34 = vpop.f32.mrf.mxu0 }
 0x132   :  { %v1041_v39 = vadd.f32 %v1040_v30, %v1027_v35  ;;  %v1068_v40 = vpop.f32.mrf.mxu1  ;;  %v1055_v52 = vadd.f32 %v1054_v34, %v342_v44 }
 0x134   :  { %v1213_v47 = vmax.f32 %v1041_v39, 0.0  ;;  %v1069_v58 = vadd.f32 %v1068_v40, %v1055_v52 }
 0x137   :  { %v1028_v38 = vpop.f32.mrf.mxu2 }
 0x138   :  { %v1029_v41 = vadd.f32 %v1028_v38, %v1015_v37  ;;  %v1042_v42 = vpop.f32.mrf.mxu3 }
 0x139   :  { %v1056_v46 = vpop.f32.mrf.mxu0 }
 0x13a   :  { %v1043_v45 = vadd.f32 %v1042_v42, %v1029_v41  ;;  %v1057_v59 = vadd.f32 %v1056_v46, %v342_v44  ;;  %v1070_v60 = vpop.f32.mrf.mxu1 }
 0x13c   :  { %v1217_v48 = vmax.f32 %v1043_v45, 0.0  ;;  %v1071_v0 = vadd.f32 %v1070_v60, %v1057_v59 }
 0x13e   :  { %v1221_v53 = vpack.c.bf16 %v1217_v48, %v1213_v47 }
 0x13f   :  { %v1082_v55 = vpop.f32.mrf.mxu2 }
 0x140   :  { %v1096_v56 = vpop.f32.mrf.mxu3  ;;  %1493 = vmatmul.bf16.vlgmr.msrb.gmra.mxu0 %v1221_v53  ;;  %v1083_v62 = vadd.f32 %v1082_v55, %v1069_v58  ;;  %v2405_v53 = vld [vmem:[%s2596_s6] ss:$0 sm:$0xff] }
 0x142   :  { %v1110_v63 = vpop.f32.mrf.mxu0  ;;  %v1097_v2 = vadd.f32 %v1096_v56, %v1083_v62 }
 0x143   :  { %v1111_v11 = vadd.f32 %v1110_v63, %v343_v7 }
 0x144   :  { %v1214_v8 = vmax.f32 %v1097_v2, 0.0 }
 0x145   :  { %v1124_v9 = vpop.f32.mrf.mxu1 }
 0x146   :  { %v1125_v15 = vadd.f32 %v1124_v9, %v1111_v11 }
 0x147   :  { %v1084_v1 = vpop.f32.mrf.mxu2 }
 0x148   :  { %v1085_v3 = vadd.f32 %v1084_v1, %v1071_v0  ;;  %v1098_v4 = vpop.f32.mrf.mxu3 }
 0x14a   :  { %v1099_v6 = vadd.f32 %v1098_v4, %v1085_v3  ;;  %v1112_v13 = vpop.f32.mrf.mxu0 }
 0x14b   :  { %v1113_v16 = vadd.f32 %v1112_v13, %v343_v7 }
 0x14c   :  { %v1218_v49 = vmax.f32 %v1099_v6, 0.0 }
 0x14d   :  { %v1126_v21 = vpop.f32.mrf.mxu1 }
 0x14e   :  { %v1222_v54 = vpack.c.bf16 %v1218_v49, %v1214_v8  ;;  %v1127_v22 = vadd.f32 %v1126_v21, %v1113_v16 }
 0x14f   :  { %v1138_v19 = vpop.f32.mrf.mxu2 }
 0x150   :  { %v1152_v12 = vpop.f32.mrf.mxu3  ;;  %1507 = vmatmul.bf16.vlgmr.msrb.gmra.mxu1 %v1222_v54  ;;  %v1139_v17 = vadd.f32 %v1138_v19, %v1125_v15 }
 0x152   :  { %v1153_v24 = vadd.f32 %v1152_v12, %v1139_v17 }
 0x154   :  { %v1215_v29 = vmax.f32 %v1153_v24, 0.0 }
 0x157   :  { %v1140_v23 = vpop.f32.mrf.mxu2 }
 0x158   :  { %v1141_v25 = vadd.f32 %v1140_v23, %v1127_v22  ;;  %v1154_v27 = vpop.f32.mrf.mxu3 }
 0x15a   :  { %v1155_v28 = vadd.f32 %v1154_v27, %v1141_v25 }
 0x15c   :  { %v1219_v30 = vmax.f32 %v1155_v28, 0.0 }
 0x15e   :  { %v1223_v31 = vpack.c.bf16 %v1219_v30, %v1215_v29 }
 0x160   :  { %1521 = vmatmul.bf16.vlgmr.msrb.gmra.mxu2 %v1223_v31 }
 0x162   :  { %v1166_v32 = vpop.f32.mrf.mxu0 }
 0x163   :  { %v1167_v35 = vadd.f32 %v1166_v32, %v344_v33 }
 0x164   :  { %v1180_v34 = vpop.f32.mrf.mxu1 }
 0x165   :  { %v1181_v39 = vadd.f32 %v1180_v34, %v1167_v35 }
 0x16a   :  { %v1168_v36 = vpop.f32.mrf.mxu0 }
 0x16b   :  { %v1169_v40 = vadd.f32 %v1168_v36, %v344_v33 }
 0x16c   :  { %v1182_v42 = vpop.f32.mrf.mxu1 }
 0x16d   :  { %v1183_v43 = vadd.f32 %v1182_v42, %v1169_v40 }
 0x16f   :  { %v1194_v37 = vpop.f32.mrf.mxu2 }
 0x170   :  { %v1208_v38 = vpop.f32.mrf.mxu3  ;;  %v1195_v41 = vadd.f32 %v1194_v37, %v1181_v39 }
 0x172   :  { %v1209_v45 = vadd.f32 %v1208_v38, %v1195_v41 }
 0x174   :  { %v1216_v50 = vmax.f32 %v1209_v45, 0.0 }
 0x177   :  { %v1196_v44 = vpop.f32.mrf.mxu2 }
 0x178   :  { %v1197_v46 = vadd.f32 %v1196_v44, %v1183_v43  ;;  %v1210_v47 = vpop.f32.mrf.mxu3 }
 0x17a   :  { %v1211_v48 = vadd.f32 %v1210_v47, %v1197_v46 }
 0x17c   :  { %v1220_v51 = vmax.f32 %v1211_v48, 0.0 }
 0x17e   :  { %v1224_v52 = vpack.c.bf16 %v1220_v51, %v1216_v50 }
 0x180   :  { %1535 = vmatmul.bf16.vlgmr.msrb.gmra.mxu3 %v1224_v52 }
 0x1bd   :  { %v1494_v20 = vpop.f32.mrf.mxu0 }
 0x1be   :  { %v1495_v57 = vadd.f32 %v2405_v53, %v1494_v20 }
 0x1c5   :  { %v1496_v60 = vpop.f32.mrf.mxu0 }
 0x1c6   :  { %v1497_v0 = vadd.f32 %v2405_v53, %v1496_v60 }
 0x1cd   :  { %v1508_v55 = vpop.f32.mrf.mxu1 }
 0x1ce   :  { %v1509_v58 = vadd.f32 %v1508_v55, %v1495_v57 }
 0x1d5   :  { %v1510_v63 = vpop.f32.mrf.mxu1 }
 0x1d6   :  { %v1511_v2 = vadd.f32 %v1510_v63, %v1497_v0 }
 0x1e3   :  { %v1522_v56 = vpop.f32.mrf.mxu2 }
 0x1e4   :  { %v1523_v59 = vadd.f32 %v1522_v56, %v1509_v58 }
 0x1eb   :  { %v1524_v1 = vpop.f32.mrf.mxu2 }
 0x1ec   :  { %v1525_v3 = vadd.f32 %v1524_v1, %v1511_v2 }
 0x203   :  { %v1536_v61 = vpop.f32.mrf.mxu3 }
 0x204   :  { %v1537_v62 = vadd.f32 %v1536_v61, %v1523_v59 }
 0x206   :  { %1541 = vst [vmem:[%s2597_s7] sm:$0xff] %v1537_v62 }
 0x20b   :  { %v1538_v4 = vpop.f32.mrf.mxu3 }
 0x20c   :  { %v1539_v5 = vadd.f32 %v1538_v4, %v1525_v3 }
 0x20e   :  { %1542 = vst [vmem:[%s2597_s7 + $0x8] sm:$0xff] %v1539_v5 }
 0x20f   :  { %1547 = vsyncpa [#allocation3], 1 }
 0x210   :  { %1548 = vsyncpa [#allocation5], 1 }

</bundles_post_ra>
